<compile_context>
chip_gen: v5e
topology: v5e:2x2
jax: 0.10.0
libtpu: 0.0.40
codegen_flags: <defaults>
</compile_context>

<pallas_src>
import functools

import jax
import jax.numpy as jnp
from jax.experimental import pallas as pl
from jax.experimental.pallas import tpu as pltpu

LEAKY_SLOPE = 0.01
BN_EPS = 1e-5
NEG_PAD = -1e30  # fills padded logit lanes so LogSoftmax ignores them


def _round_up(x, m):
    return ((x + m - 1) // m) * m


def _mlp_layer_kernel(n_blocks, inv_batch, x_ref, w_ref, v_ref, out_ref, h_ref):
    """One grid step == one layer.

    x_ref:   [B, D] f32 (resident)                 w_ref: [D, D] bf16, layer l, [in, out]
    v_ref:   [8, D] f32, rows: bias, gamma, beta   out_ref: [B, D] f32 (written on last step)
    h_ref:   [B, D] f32 VMEM scratch carrying activations across layers.
    """
    l = pl.program_id(0)

    @pl.when(l == 0)
    def _():
        h_ref[...] = x_ref[...]

    # Linear on the MXU: bf16 x bf16 -> f32 accumulate; weight already [in, out]
    # so the contraction is canonical (LHS dim 1 with RHS dim 0), no transpose.
    y = jax.lax.dot_general(
        h_ref[...].astype(jnp.bfloat16), w_ref[...],
        dimension_numbers=(((1,), (0,)), ((), ())),
        preferred_element_type=jnp.float32,
    ) + v_ref[0:1, :]

    @pl.when(l < n_blocks)
    def _():
        g = v_ref[1:2, :]
        be = v_ref[2:3, :]
        # LeakyReLU (slope < 1): single vmax + vmul.
        a = jnp.maximum(y, LEAKY_SLOPE * y)
        # BatchNorm1d, training-mode, two-pass (biased variance). Padded lanes stay 0.
        mean = jnp.sum(a, axis=0, keepdims=True) * inv_batch
        c = a - mean
        var = jnp.sum(c * c, axis=0, keepdims=True) * inv_batch
        h_ref[...] = c * jax.lax.rsqrt(var + BN_EPS) * g + be

    @pl.when(l == n_blocks)
    def _():
        # Output layer: padded bias lanes are NEG_PAD -> dead in LogSoftmax.
        m = jnp.max(y, axis=-1, keepdims=True)
        shifted = y - m
        lse = jnp.log(jnp.sum(jnp.exp(shifted), axis=-1, keepdims=True))
        out_ref[...] = shifted - lse


def init_params(key, input_size, output_size, hidden_sizes):
    """PyTorch-style init: Linear ~ U(-1/sqrt(fan_in), 1/sqrt(fan_in)), BN gamma=1, beta=0.
    Returns (blocks, (w_out, b_out)) in PyTorch [out, in] layout, f32."""
    blocks = []
    last = input_size
    for h in hidden_sizes:
        key, kw, kb = jax.random.split(key, 3)
        bound = 1.0 / float(last) ** 0.5
        w = jax.random.uniform(kw, (h, last), jnp.float32, -bound, bound)
        b = jax.random.uniform(kb, (h,), jnp.float32, -bound, bound)
        gamma = jnp.ones((h,), jnp.float32)
        beta = jnp.zeros((h,), jnp.float32)
        blocks.append((w, b, gamma, beta))
        last = h
    key, kw, kb = jax.random.split(key, 3)
    bound = 1.0 / float(last) ** 0.5
    w_out = jax.random.uniform(kw, (output_size, last), jnp.float32, -bound, bound)
    b_out = jax.random.uniform(kb, (output_size,), jnp.float32, -bound, bound)
    return blocks, (w_out, b_out)


def pack_params(blocks, out_layer, output_size, d_pad):
    """Pack per-layer weights (pre-transposed to [in, out], bf16) into one
    [n_layers, d_pad, d_pad] slab, and per-layer vectors into [n_layers, 8, d_pad] f32
    (row 0 bias, row 1 gamma, row 2 beta; rows 3-7 zero pad for the (8,128) tiling).
    The output-layer bias row is NEG_PAD outside the valid classes."""
    n_blocks = len(blocks)
    n_layers = n_blocks + 1
    w_stack = jnp.zeros((n_layers, d_pad, d_pad), jnp.bfloat16)
    v_stack = jnp.zeros((n_layers, 8, d_pad), jnp.float32)

    for i, (w, b, g, be) in enumerate(blocks):
        out_f, in_f = w.shape
        w_stack = w_stack.at[i, :in_f, :out_f].set(w.T.astype(jnp.bfloat16))
        v_stack = v_stack.at[i, 0, :out_f].set(b)
        v_stack = v_stack.at[i, 1, :out_f].set(g)
        v_stack = v_stack.at[i, 2, :out_f].set(be)

    w_out, b_out = out_layer
    out_f, in_f = w_out.shape
    w_stack = w_stack.at[n_blocks, :in_f, :out_f].set(w_out.T.astype(jnp.bfloat16))
    v_stack = v_stack.at[n_blocks, 0, :].set(NEG_PAD)
    v_stack = v_stack.at[n_blocks, 0, :output_size].set(b_out)
    return w_stack, v_stack


def image_classifier_forward(x, w_stack, v_stack, n_blocks, input_size, output_size, d_pad):
    batch = x.shape[0]
    n_layers = n_blocks + 1

    # Lane-dense input slab (wrapper-side layout plumbing).
    x_pad = jnp.zeros((batch, d_pad), jnp.float32).at[:, :input_size].set(
        x.astype(jnp.float32))

    kernel = functools.partial(_mlp_layer_kernel, n_blocks, 1.0 / float(batch))

    # VMEM residency: x + out + h scratch (f32) + double-buffered bf16 weight tile
    # + double-buffered f32 vector tile. (Sized for this call; well under v7x 64 MiB.)
    vmem_bytes = (3 * batch * d_pad * 4
                  + 2 * d_pad * d_pad * 2
                  + 2 * 8 * d_pad * 4)
    vmem_limit = min(int(2 * vmem_bytes + (8 << 20)), 64 << 20)

    cost = pl.CostEstimate(
        flops=int(2 * batch * d_pad * d_pad * n_layers + 12 * batch * d_pad * n_layers),
        transcendentals=int(batch * d_pad + n_blocks * d_pad + batch),
        bytes_accessed=int(x_pad.size * 4 + w_stack.size * 2 + v_stack.size * 4
                           + batch * d_pad * 4),
    )

    grid_spec = pltpu.PrefetchScalarGridSpec(
        num_scalar_prefetch=0,
        grid=(n_layers,),
        in_specs=[
            # Activations input: constant block -> stays resident.
            pl.BlockSpec((batch, d_pad), lambda l: (0, 0)),
            # Per-layer bf16 weight tile: streamed / double-buffered across layers.
            pl.BlockSpec((None, d_pad, d_pad), lambda l: (l, 0, 0)),
            # Per-layer bias/gamma/beta rows.
            pl.BlockSpec((None, 8, d_pad), lambda l: (l, 0, 0)),
        ],
        out_specs=pl.BlockSpec((batch, d_pad), lambda l: (0, 0)),  # written on last step
        scratch_shapes=[pltpu.VMEM((batch, d_pad), jnp.float32)],  # activation carry
    )

    out_pad = pl.pallas_call(
        kernel,
        out_shape=jax.ShapeDtypeStruct((batch, d_pad), jnp.float32),
        grid_spec=grid_spec,
        compiler_params=pltpu.CompilerParams(
            dimension_semantics=("arbitrary",),
            vmem_limit_bytes=vmem_limit,
        ),
        cost_estimate=cost,
    )(x_pad, w_stack, v_stack)

    return out_pad[:, :output_size]


def reference_forward(x, blocks, out_layer, cast_dots_to_bf16=False):
    """Pure-JAX reference mirroring the PyTorch forward (training-mode BN, two-pass stats).
    With cast_dots_to_bf16=True it mirrors the kernel's bf16 matmul numerics exactly."""
    def dot(h, w_t):
        if cast_dots_to_bf16:
            return jnp.dot(h.astype(jnp.bfloat16), w_t.astype(jnp.bfloat16),
                           preferred_element_type=jnp.float32)
        return h @ w_t

    h = x.astype(jnp.float32)
    for w, b, g, be in blocks:
        z = dot(h, w.T) + b
        a = jnp.where(z >= 0.0, z, LEAKY_SLOPE * z)
        mean = jnp.mean(a, axis=0, keepdims=True)
        var = jnp.mean((a - mean) ** 2, axis=0, keepdims=True)
        if cast_dots_to_bf16:
            h = (a - mean) * jax.lax.rsqrt(var + BN_EPS) * g + be
        else:
            h = (a - mean) / jnp.sqrt(var + BN_EPS) * g + be
    w_out, b_out = out_layer
    logits = dot(h, w_out.T) + b_out
    return jax.nn.log_softmax(logits, axis=-1)


if __name__ == "__main__":
    # MLP over flattened image features. Batch=128 fills the MXU M dimension while
    # staying trivially small in VMEM; BN batch stats remain exact (whole batch resident).
    batch = 128
    input_size = 32
    hidden_sizes = [64, 48, 32]
    output_size = 10
    n_blocks = len(hidden_sizes)

    # Common lane-dense feature width (all demo dims pad to 128).
    d_pad = _round_up(max([input_size, output_size] + hidden_sizes), 128)

    key = jax.random.PRNGKey(0)
    key, kx = jax.random.split(key)
    x = jax.random.normal(kx, (batch, input_size), jnp.float32)

    blocks, out_layer = init_params(key, input_size, output_size, hidden_sizes)
    w_stack, v_stack = pack_params(blocks, out_layer, output_size, d_pad)

    out = image_classifier_forward(x, w_stack, v_stack, n_blocks,
                                   input_size, output_size, d_pad)
    out = jax.block_until_ready(out)
    assert out.shape == (batch, output_size)

    # Tight check vs. a reference that mirrors the kernel's bf16-weight matmul numerics.
    ref_bf16 = reference_forward(x, blocks, out_layer, cast_dots_to_bf16=True)
    assert jnp.allclose(out, ref_bf16, atol=2e-3, rtol=2e-3), \
        "mismatch vs bf16-matched reference"

    # Looser check vs. the full-f32 PyTorch-semantics reference (bf16 matmul rounding).
    ref_f32 = reference_forward(x, blocks, out_layer, cast_dots_to_bf16=False)
    assert jnp.allclose(out, ref_f32, atol=5e-2, rtol=5e-2), \
        "mismatch vs f32 reference"

    # TODO(synk): nn.Dropout path (use_batch_norm=False) not implemented; default config uses BatchNorm.
    print("KERNEL_OK")
</pallas_src>

<mosaic_0001>
module attributes {stable_mosaic.version = 11 : i64} {
  func.func @_mlp_layer_kernel(%arg0: i32, %arg1: memref<128x128xf32, #tpu.memory_space<vmem>>, %arg2: memref<1x128x128xbf16, #tpu.memory_space<vmem>>, %arg3: memref<1x8x128xf32, #tpu.memory_space<vmem>>, %arg4: memref<128x128xf32, #tpu.memory_space<vmem>>, %arg5: memref<128x128xf32, #tpu.memory_space<vmem>>) attributes {dimension_semantics = [#tpu.dimension_semantics<arbitrary>], iteration_bounds = array<i64: 4>, scalar_prefetch = 0 : i64, scratch_operands = 1 : i64, tpu.core_type = #tpu.core_type<tc>, window_params = [{pipeline_mode = #tpu.pipeline_mode<synchronous>, transform_indices = @transform_0, window_bounds = array<i64: 128, 128>}, {transform_indices = @transform_1, window_bounds = array<i64: 1, 128, 128>}, {transform_indices = @transform_2, window_bounds = array<i64: 1, 8, 128>}, {pipeline_mode = #tpu.pipeline_mode<synchronous>, transform_indices = @transform_3, window_bounds = array<i64: 128, 128>}]} {
    %c0_i32 = arith.constant 0 : i32
    %0 = arith.cmpi eq, %arg0, %c0_i32 : i32
    %1 = arith.extui %0 : i1 to i32
    %c0_i32_0 = arith.constant 0 : i32
    %2 = arith.cmpi ne, %1, %c0_i32_0 : i32
    scf.if %2 {
      %c0_11 = arith.constant 0 : index
      %c0_12 = arith.constant 0 : index
      %18 = vector.load %arg1[%c0_11, %c0_12] : memref<128x128xf32, #tpu.memory_space<vmem>>, vector<128x128xf32>
      %c0_13 = arith.constant 0 : index
      %c0_14 = arith.constant 0 : index
      %19 = vector.load %arg5[%c0_13, %c0_14] : memref<128x128xf32, #tpu.memory_space<vmem>>, vector<128x128xf32>
      tpu.vector_store %arg5[%c0_13, %c0_14], %18 {strides = array<i32>} : memref<128x128xf32, #tpu.memory_space<vmem>>, vector<128x128xf32>,
    } else {
    }
    %c0 = arith.constant 0 : index
    %c0_1 = arith.constant 0 : index
    %3 = vector.load %arg5[%c0, %c0_1] : memref<128x128xf32, #tpu.memory_space<vmem>>, vector<128x128xf32>
    %4 = arith.truncf %3 : vector<128x128xf32> to vector<128x128xbf16>
    %c0_2 = arith.constant 0 : index
    %c0_3 = arith.constant 0 : index
    %c0_4 = arith.constant 0 : index
    %5 = vector.load %arg2[%c0_2, %c0_3, %c0_4] : memref<1x128x128xbf16, #tpu.memory_space<vmem>>, vector<1x128x128xbf16>
    %6 = vector.shape_cast %5 : vector<1x128x128xbf16> to vector<128x128xbf16>
    %cst = arith.constant dense<0.000000e+00> : vector<128x128xf32>
    %7 = tpu.matmul %4, %6, %cst {dimension_numbers = #tpu.dot_dimension_numbers<[1], [0], [0], [1], [0, 0, 1, 1], [], []>} : vector<128x128xbf16>, vector<128x128xbf16>, vector<128x128xf32> -> vector<128x128xf32>
    %c0_5 = arith.constant 0 : index
    %c0_6 = arith.constant 0 : index
    %c0_7 = arith.constant 0 : index
    %8 = vector.load %arg3[%c0_5, %c0_6, %c0_7] : memref<1x8x128xf32, #tpu.memory_space<vmem>>, vector<1x1x128xf32>
    %9 = vector.shape_cast %8 : vector<1x1x128xf32> to vector<1x128xf32>
    %10 = vector.broadcast %9 : vector<1x128xf32> to vector<128x128xf32>
    %11 = arith.addf %7, %10 : vector<128x128xf32>
    %c3_i32 = arith.constant 3 : i32
    %12 = arith.cmpi slt, %arg0, %c3_i32 : i32
    %13 = arith.extui %12 : i1 to i32
    %c0_i32_8 = arith.constant 0 : i32
    %14 = arith.cmpi ne, %13, %c0_i32_8 : i32
    scf.if %14 {
      %c0_11 = arith.constant 0 : index
      %c1 = arith.constant 1 : index
      %c0_12 = arith.constant 0 : index
      %18 = vector.load %arg3[%c0_11, %c1, %c0_12] : memref<1x8x128xf32, #tpu.memory_space<vmem>>, vector<1x1x128xf32>
      %19 = vector.shape_cast %18 : vector<1x1x128xf32> to vector<1x128xf32>
      %c0_13 = arith.constant 0 : index
      %c2 = arith.constant 2 : index
      %c0_14 = arith.constant 0 : index
      %20 = vector.load %arg3[%c0_13, %c2, %c0_14] : memref<1x8x128xf32, #tpu.memory_space<vmem>>, vector<1x1x128xf32>
      %21 = vector.shape_cast %20 : vector<1x1x128xf32> to vector<1x128xf32>
      %cst_15 = arith.constant 0.00999999977 : f32
      %22 = vector.broadcast %cst_15 : f32 to vector<128x128xf32>
      %23 = arith.mulf %22, %11 : vector<128x128xf32>
      %24 = arith.maximumf %11, %23 : vector<128x128xf32>
      %cst_16 = arith.constant dense<0.000000e+00> : vector<128xf32>
      %25 = vector.multi_reduction <add>, %24, %cst_16 [0] : vector<128x128xf32> to vector<128xf32>
      %26 = vector.shape_cast %25 : vector<128xf32> to vector<1x128xf32>
      %cst_17 = arith.constant 7.812500e-03 : f32
      %27 = vector.broadcast %cst_17 : f32 to vector<1x128xf32>
      %28 = arith.mulf %26, %27 : vector<1x128xf32>
      %29 = vector.broadcast %28 : vector<1x128xf32> to vector<128x128xf32>
      %30 = arith.subf %24, %29 : vector<128x128xf32>
      %31 = arith.mulf %30, %30 : vector<128x128xf32>
      %cst_18 = arith.constant dense<0.000000e+00> : vector<128xf32>
      %32 = vector.multi_reduction <add>, %31, %cst_18 [0] : vector<128x128xf32> to vector<128xf32>
      %33 = vector.shape_cast %32 : vector<128xf32> to vector<1x128xf32>
      %cst_19 = arith.constant 7.812500e-03 : f32
      %34 = vector.broadcast %cst_19 : f32 to vector<1x128xf32>
      %35 = arith.mulf %33, %34 : vector<1x128xf32>
      %cst_20 = arith.constant 9.99999974E-6 : f32
      %36 = vector.broadcast %cst_20 : f32 to vector<1x128xf32>
      %37 = arith.addf %35, %36 : vector<1x128xf32>
      %38 = math.rsqrt %37 : vector<1x128xf32>
      %39 = vector.broadcast %38 : vector<1x128xf32> to vector<128x128xf32>
      %40 = arith.mulf %30, %39 : vector<128x128xf32>
      %41 = vector.broadcast %19 : vector<1x128xf32> to vector<128x128xf32>
      %42 = arith.mulf %40, %41 : vector<128x128xf32>
      %43 = vector.broadcast %21 : vector<1x128xf32> to vector<128x128xf32>
      %44 = arith.addf %42, %43 : vector<128x128xf32>
      %c0_21 = arith.constant 0 : index
      %c0_22 = arith.constant 0 : index
      %45 = vector.load %arg5[%c0_21, %c0_22] : memref<128x128xf32, #tpu.memory_space<vmem>>, vector<128x128xf32>
      tpu.vector_store %arg5[%c0_21, %c0_22], %44 {strides = array<i32>} : memref<128x128xf32, #tpu.memory_space<vmem>>, vector<128x128xf32>,
    } else {
    }
    %c3_i32_9 = arith.constant 3 : i32
    %15 = arith.cmpi eq, %arg0, %c3_i32_9 : i32
    %16 = arith.extui %15 : i1 to i32
    %c0_i32_10 = arith.constant 0 : i32
    %17 = arith.cmpi ne, %16, %c0_i32_10 : i32
    scf.if %17 {
      %cst_11 = arith.constant dense<0xFF800000> : vector<128xf32>
      %18 = vector.multi_reduction <maximumf>, %11, %cst_11 [1] : vector<128x128xf32> to vector<128xf32>
      %19 = vector.shape_cast %18 : vector<128xf32> to vector<128x1xf32>
      %20 = vector.broadcast %19 : vector<128x1xf32> to vector<128x128xf32>
      %21 = arith.subf %11, %20 : vector<128x128xf32>
      %22 = math.exp %21 : vector<128x128xf32>
      %cst_12 = arith.constant dense<0.000000e+00> : vector<128xf32>
      %23 = vector.multi_reduction <add>, %22, %cst_12 [1] : vector<128x128xf32> to vector<128xf32>
      %24 = vector.shape_cast %23 : vector<128xf32> to vector<128x1xf32>
      %25 = math.log %24 : vector<128x1xf32>
      %26 = vector.broadcast %25 : vector<128x1xf32> to vector<128x128xf32>
      %27 = arith.subf %21, %26 : vector<128x128xf32>
      %c0_13 = arith.constant 0 : index
      %c0_14 = arith.constant 0 : index
      %28 = vector.load %arg4[%c0_13, %c0_14] : memref<128x128xf32, #tpu.memory_space<vmem>>, vector<128x128xf32>
      tpu.vector_store %arg4[%c0_13, %c0_14], %27 {strides = array<i32>} : memref<128x128xf32, #tpu.memory_space<vmem>>, vector<128x128xf32>,
    } else {
    }
    return
  }
  func.func @transform_0(%arg0: i32) -> (i32, i32) {
    %c0_i32 = arith.constant 0 : i32
    %c0_i32_0 = arith.constant 0 : i32
    %c0_i32_1 = arith.constant 0 : i32
    return %c0_i32, %c0_i32_0 : i32, i32
  }
  func.func @transform_1(%arg0: i32) -> (i32, i32, i32) {
    %c0_i32 = arith.constant 0 : i32
    %c0_i32_0 = arith.constant 0 : i32
    %c0_i32_1 = arith.constant 0 : i32
    return %arg0, %c0_i32, %c0_i32_0 : i32, i32, i32
  }
  func.func @transform_2(%arg0: i32) -> (i32, i32, i32) {
    %c0_i32 = arith.constant 0 : i32
    %c0_i32_0 = arith.constant 0 : i32
    %c0_i32_1 = arith.constant 0 : i32
    return %arg0, %c0_i32, %c0_i32_0 : i32, i32, i32
  }
  func.func @transform_3(%arg0: i32) -> (i32, i32) {
    %c0_i32 = arith.constant 0 : i32
    %c0_i32_0 = arith.constant 0 : i32
    %c0_i32_1 = arith.constant 0 : i32
    return %c0_i32, %c0_i32_0 : i32, i32
  }
}

</mosaic_0001>

<bundles_post_ra>
// kernel: tpu_custom_call.1
= control target key start
LH: loop header
LB: loop body
LE: loop exit
PB: predicated region body
PF: predicated region fallthrough
CT: control target
= control target key end

     0   :  { %8 = vsyncpa [#allocation4], 0  ;;  %s1673_s0 = inlined_call_operand.hbm [shape: f32[128,128], index: 0, kind: input, shape index: {}]   ;;  %s1674_s1 = inlined_call_operand.hbm [shape: bf16[4,128,128], index: 1, kind: input, shape index: {}]   ;;  %s1675_s2 = inlined_call_operand.hbm [shape: f32[4,8,128], index: 2, kind: input, shape index: {}]   ;;  %s1676_s3 = inlined_call_operand.hbm [shape: f32[128,128], index: 3, kind: output, shape index: {}]  }
   0x1   :  { %9 = vsyncpa [#allocation7], 0 }
   0x2   :  { %11 = vsyncpa [#allocation7 + $0x1], 0 }
   0x3   :  { %12 = vsyncpa [#allocation5], 0  ;;  %s1283_s12 = smov 0   ;;  %s1285_s13 = smov 0  }
   0x4   :  { %s1287_s14 = smov 0   ;;  %s1289_s15 = smov 0  }
   0x5 LB: > { %s1304_s16 = sadd.s32 1, %s1253_s15   ;;  %s46_s17 = sadd.s32 1, %s1249_s14  ;;  %s1253_s15 = sphi %s1289_s15, %s1683_s15   ;;  %s1249_s14 = sphi %s1287_s14, %s1682_s14   ;;  %s1245_s13 = sphi %s1285_s13, %s1681_s13   ;;  %s1241_s12 = sphi %s1283_s12, %s1680_s12  }
   0x6   : > { %s43_s18 = ssub.s32 %s1253_s15, %s1304_s16  ;;  %p53_p0 = scmp.ne.s32.totalorder %s1249_s14, %s1245_s13 }
   0x7   : > { %p44_p1 = scmp.eq.s32.totalorder %s43_s18, 0  ;;  %p54_p2 = scmp.eq.s32.totalorder %s1253_s15, 0 }
   0x8   : > { %p980_p3 = scmp.lt.s32.totalorder %s1253_s15, 4  ;;  %s144_s20 = sand.u32 1, %s1253_s15  }
   0x9   : > { %s1314_s19 = scalar_select %p44_p1, %s1249_s14, %s46_s17  }
   0xa   : > { %p55_p4 = por %p54_p2, %p53_p0  ;;  %s146_s21 = sand.u32 1, %s1249_s14  }
   0xb   : > { %s875_s22 = sshll.u32 %s146_s21, 6  ;;  %s923_s23 = sshll.u32 %s1253_s15, 6 }
   0xc   : > { %s153_s26 = scalar_lea.hbm %s1674_s1, %s923_s23  ;;  %s148_s28 = scalar_lea.vmem [#allocation6], %s875_s22 }
   0xd   : > { %s154_s27 = sshll.u32 %s153_s26, 4  ;;  %s156_s29 = sshll.u32 %s148_s28, 4  ;;  %s155_s27 = int_to_ptr.hbm [resolvable:$true] %s154_s27  ;;  %s157_s29 = int_to_ptr.vmem [resolvable:$true] %s156_s29 }
   0xe   : > { %p1326_p5 = pnand %p980_p3, %p55_p4  ;;  %s1330_s4 = scalar_lea.sflag [#allocation7], %s144_s20 }
   0xf   : > { %s1093_s5 = sshra.s32 %s155_s27, 4  ;;  %s1100_s9 = scalar_lea.hbm %s1674_s1, 256  ;;  %s1094_s5 = int_to_ptr.hbm [resolvable:$true] %s1093_s5 }
  0x10   : > { %s1095_s6 = scalar_lea.hbm %s1094_s5, 64  ;;  %p1097_p7 = pneg %p1326_p5 }
  0x11   : > { %p1096_p6 = scmp.ne.s32.totalorder %s1094_s5, %s1095_s6  ;;  %p1101_p10 = scmp.lt.s32.totalorder %s1094_s5, %s1674_s1 }
  0x12   : > { %p1102_p11 = scmp.lt.s32.totalorder %s1100_s9, %s1095_s6 }
  0x13   : > { %p1098_p8 = pnand %p1097_p7, %p1096_p6 }
  0x14   : > { %p1103_p12 = por %p1102_p11, %p1101_p10 }
  0x15   : > { %p1099_p9 = pneg %p1098_p8 }
  0x17   : > { %p1104_p13 = pnand %p1103_p12, %p1099_p9 }
  0x19   : > { %1107 = shalt.err (!%p1104_p13)
}
  0x1a   : > { %s1255_s17 = smov 64   ;;  %s1256_s18 = smov 4  }
  0x1b   : > { %975 = dma.hbm_to_vmem [thread:$0]  (!%p1326_p5), %s155_s27, 1024, %s157_s29, %s1330_s4, %s1255_s17, %s1255_s17, %s1256_s18  }
  0x1c   : > { %s1347_s20 = sadd.s32 4294967295, %s1253_s15   ;;  %p59_p0 = scmp.ne.s32.totalorder %s1245_s13, %s1241_s12 }
  0x1d   : > { %p60_p1 = scmp.eq.s32.totalorder %s1347_s20, 0  ;;  %p872_p2 = scmp.ge.s32.totalorder %s1253_s15, 1 }
  0x1e   : > { %p117_p3 = scmp.lt.s32.totalorder %s1253_s15, 5  ;;  %p873_p4 = scmp.ne.s32.totalorder %s1347_s20, 0 }
  0x1f   : > { %p1357_p6 = por %p60_p1, %p59_p0  ;;  %s128_s25 = sshll.u32 %s1673_s0, 4  ;;  %s129_s25 = int_to_ptr.hbm [resolvable:$true] %s128_s25 }
  0x20   : > { %p1364_p8 = pnand %p872_p2, %p117_p3  ;;  %s1257_s12 = smov [#allocation3]  }
  0x21   : > { %s130_s27 = sshll.u32 %s1257_s12, 4  ;;  %s878_s28 = sshll.u32 %s146_s21, 3  ;;  %s131_s27 = int_to_ptr.vmem [resolvable:$true] %s130_s27 }
  0x22   : > { %p968_p9 = pneg %p1364_p8  ;;  %s879_s29 = sshll.u32 %s1253_s15, 3 }
  0x23   : > { %s174_s7 = scalar_lea.hbm %s1675_s2, %s879_s29  ;;  %s1258_s8 = smov 128  }
  0x24   : > { %p969_p10 = pnand %p968_p9, %p60_p1  ;;  %s1259_s9 = smov 8  }
  0x25   : > { %s176_s10 = sshll.u32 %s174_s7, 4  ;;  %s170_s11 = scalar_lea.vmem [#allocation8], %s878_s28  ;;  %s177_s10 = int_to_ptr.hbm [resolvable:$true] %s176_s10 }
  0x26   : > { %971 = dma.hbm_to_vmem [thread:$0]  (!%p969_p10), %s129_s25, 2048, %s131_s27, [#allocation4], %s1258_s8, %s1258_s8, %s1259_s9  }
  0x27   : > { %s178_s17 = sshll.u32 %s170_s11, 4  ;;  %s1153_s18 = sshra.s32 %s177_s10, 4  ;;  %s179_s17 = int_to_ptr.vmem [resolvable:$true] %s178_s17  ;;  %s1154_s18 = int_to_ptr.hbm [resolvable:$true] %s1153_s18 }
  0x28   : > { %s1155_s23 = scalar_lea.hbm %s1154_s18, 8  ;;  %s1160_s24 = scalar_lea.hbm %s1675_s2, 32 }
  0x29   : > { %p1156_p11 = scmp.ne.s32.totalorder %s1154_s18, %s1155_s23  ;;  %p1161_p0 = scmp.lt.s32.totalorder %s1154_s18, %s1675_s2 }
  0x2a   : > { %p1162_p2 = scmp.lt.s32.totalorder %s1160_s24, %s1155_s23 }
  0x2b   : > { %p1158_p12 = pnand %p1156_p11, %p1097_p7 }
  0x2c   : > { %p1163_p3 = por %p1162_p2, %p1161_p0 }
  0x2d   : > { %p1159_p13 = pneg %p1158_p12 }
  0x2f   : > { %p1164_p9 = pnand %p1163_p3, %p1159_p13 }
  0x31   : > { %1167 = shalt.err (!%p1164_p9)
}
  0x32   : > { %978 = dma.hbm_to_vmem [thread:$0]  (!%p1326_p5), %s177_s10, 128, %s179_s17, %s1330_s4  }
  0x33   : > { %187 = sbr.rel (%p1364_p8) target bundleno = 722 (0x2d2), region = 32 }
  0x38   : > { %1228 = dma.done.wait (%p60_p1), [#allocation4], 2048  }
  0x39   : > { %1230 = vsyncadd (%p60_p1), [#allocation4], 4294965248  ;;  %s194_s25 = sand.u32 1, %s1347_s20   ;;  %s196_s27 = sand.u32 1, %s1245_s13  }
  0x3a   : > { %s882_s28 = sshll.u32 %s196_s27, 6  ;;  %s195_s5 = scalar_lea.sflag [#allocation7], %s194_s25 }
  0x3b   : > { %s1398_s6 = scalar_lea.vmem [#allocation6], %s882_s28 }
  0x3c   : > { %1232 = dma.done.wait (%p1357_p6), %s195_s5, 1152  }
  0x3d   : > { %1234 = vsyncadd (%p1357_p6), %s195_s5, 4294966144  ;;  %s883_s30 = sshll.u32 %s196_s27, 3  ;;  %235 = sbr.rel (%p873_p4) target bundleno = 83 (0x53), region = 48 }
  0x3e   : > { %s1404_s4 = scalar_lea.vmem [#allocation8], %s883_s30 }
  0x42   : > { %v236_v0 = vld [vmem:[#allocation3] sm:$0xff]  ;;  %v237_v1 = vld [vmem:[#allocation3 + $0x8] sm:$0xff]  ;;  %v238_v2 = vld [vmem:[#allocation3 + $0x10] sm:$0xff] }
  0x43   : > { %252 = vst [vmem:[#allocation2 + $0x30] sm:$0xff] %v236_v0  ;;  %v239_v3 = vld [vmem:[#allocation3 + $0x18] sm:$0xff]  ;;  %v240_v4 = vld [vmem:[#allocation3 + $0x20] sm:$0xff]  ;;  %v241_v5 = vld [vmem:[#allocation3 + $0x28] sm:$0xff] }
  0x44   : > { %253 = vst [vmem:[#allocation2] sm:$0xff] %v237_v1  ;;  %v242_v6 = vld [vmem:[#allocation3 + $0x30] sm:$0xff]  ;;  %v243_v7 = vld [vmem:[#allocation3 + $0x38] sm:$0xff]  ;;  %v244_v8 = vld [vmem:[#allocation3 + $0x40] sm:$0xff] }
  0x45   : > { %254 = vst [vmem:[#allocation2 + $0x58] sm:$0xff] %v238_v2  ;;  %v245_v9 = vld [vmem:[#allocation3 + $0x48] sm:$0xff]  ;;  %v246_v10 = vld [vmem:[#allocation3 + $0x50] sm:$0xff]  ;;  %v247_v11 = vld [vmem:[#allocation3 + $0x58] sm:$0xff] }
  0x46   : > { %255 = vst [vmem:[#allocation2 + $0x18] sm:$0xff] %v239_v3  ;;  %v248_v12 = vld [vmem:[#allocation3 + $0x60] sm:$0xff]  ;;  %v249_v13 = vld [vmem:[#allocation3 + $0x68] sm:$0xff]  ;;  %v250_v14 = vld [vmem:[#allocation3 + $0x70] sm:$0xff] }
  0x47   : > { %256 = vst [vmem:[#allocation2 + $0x50] sm:$0xff] %v240_v4  ;;  %v251_v15 = vld [vmem:[#allocation3 + $0x78] sm:$0xff] }
  0x48   : > { %257 = vst [vmem:[#allocation2 + $0x68] sm:$0xff] %v241_v5 }
  0x49   : > { %258 = vst [vmem:[#allocation2 + $0x8] sm:$0xff] %v242_v6 }
  0x4a   : > { %259 = vst [vmem:[#allocation2 + $0x48] sm:$0xff] %v243_v7 }
  0x4b   : > { %260 = vst [vmem:[#allocation2 + $0x40] sm:$0xff] %v244_v8 }
  0x4c   : > { %261 = vst [vmem:[#allocation2 + $0x20] sm:$0xff] %v245_v9 }
  0x4d   : > { %262 = vst [vmem:[#allocation2 + $0x10] sm:$0xff] %v246_v10 }
  0x4e   : > { %263 = vst [vmem:[#allocation2 + $0x38] sm:$0xff] %v247_v11 }
  0x4f   : > { %264 = vst [vmem:[#allocation2 + $0x60] sm:$0xff] %v248_v12 }
  0x50   : > { %265 = vst [vmem:[#allocation2 + $0x70] sm:$0xff] %v249_v13 }
  0x51   : > { %266 = vst [vmem:[#allocation2 + $0x78] sm:$0xff] %v250_v14 }
  0x52   : > { %267 = vst [vmem:[#allocation2 + $0x28] sm:$0xff] %v251_v15 }
  0x53 PF: > { %v931_v16 = vld [vmem:[%s1398_s6 + $0x38] sm:$0xff]  ;;  %v930_v17 = vld [vmem:[%s1398_s6 + $0x30] sm:$0xff]  ;;  %v929_v18 = vld [vmem:[%s1398_s6 + $0x28] sm:$0xff]  ;;  %p917_p5 = scmp.ge.s32.totalorder %s1347_s20, 3 }
  0x54   : > { %358 = vmatpush.bf16.msra.mxu0 %v931_v16  ;;  %932 = vmatpush.bf16.msra.mxu1 %v931_v16  ;;  %v928_v19 = vld [vmem:[%s1398_s6 + $0x20] sm:$0xff]  ;;  %v927_v20 = vld [vmem:[%s1398_s6 + $0x18] sm:$0xff]  ;;  %v926_v21 = vld [vmem:[%s1398_s6 + $0x10] sm:$0xff] }
  0x55   : > { %933 = vmatpush.bf16.msra.mxu2 %v931_v16  ;;  %934 = vmatpush.bf16.msra.mxu3 %v931_v16  ;;  %v925_v22 = vld [vmem:[%s1398_s6 + $0x8] sm:$0xff]  ;;  %v924_v23 = vld [vmem:[%s1398_s6] sm:$0xff]  ;;  %v268_v24 = vld [vmem:[#allocation2 + $0x30] sm:$0xff] }
  0x56   : > { %v269_v25 = vld [vmem:[#allocation2] sm:$0xff]  ;;  %v272_v26 = vld [vmem:[#allocation2 + $0x50] sm:$0xff]  ;;  %v273_v27 = vld [vmem:[#allocation2 + $0x68] sm:$0xff] }
  0x57   : > { %v276_v28 = vld [vmem:[#allocation2 + $0x40] sm:$0xff]  ;;  %v281_v31 = vld [vmem:[#allocation2 + $0x70] sm:$0xff]  ;;  %v284_v32 = vpack.c.bf16 %v269_v25, %v268_v24  ;;  %v286_v33 = vpack.c.bf16 %v273_v27, %v272_v26  ;;  %v270_v36 = vld [vmem:[#allocation2 + $0x58] sm:$0xff] }
  0x58   : > { %359 = vmatpush.bf16.msra.mxu0 %v930_v17  ;;  %935 = vmatpush.bf16.msra.mxu1 %v930_v17  ;;  %v277_v29 = vld [vmem:[#allocation2 + $0x20] sm:$0xff]  ;;  %v271_v37 = vld [vmem:[#allocation2 + $0x18] sm:$0xff]  ;;  %v274_v38 = vld [vmem:[#allocation2 + $0x8] sm:$0xff] }
  0x59   : > { %936 = vmatpush.bf16.msra.mxu2 %v930_v17  ;;  %937 = vmatpush.bf16.msra.mxu3 %v930_v17  ;;  %v280_v30 = vld [vmem:[#allocation2 + $0x60] sm:$0xff]  ;;  %v288_v34 = vpack.c.bf16 %v277_v29, %v276_v28  ;;  %v275_v39 = vld [vmem:[#allocation2 + $0x48] sm:$0xff]  ;;  %v278_v40 = vld [vmem:[#allocation2 + $0x10] sm:$0xff]  ;;  %v285_v44 = vpack.c.bf16 %v271_v37, %v270_v36 }
  0x5a   : > { %v290_v35 = vpack.c.bf16 %v281_v31, %v280_v30  ;;  %v279_v41 = vld [vmem:[#allocation2 + $0x38] sm:$0xff]  ;;  %v283_v43 = vld [vmem:[#allocation2 + $0x28] sm:$0xff]  ;;  %v287_v45 = vpack.c.bf16 %v275_v39, %v274_v38 }
  0x5b   : > { %v282_v42 = vld [vmem:[#allocation2 + $0x78] sm:$0xff]  ;;  %v289_v46 = vpack.c.bf16 %v279_v41, %v278_v40  ;;  %v1024_v48 = vld [vmem:[%s1404_s4] ss:$0 sm:$0xff] }
  0x5c   : > { %360 = vmatpush.bf16.msra.mxu0 %v929_v18  ;;  %938 = vmatpush.bf16.msra.mxu1 %v929_v18  ;;  %v291_v47 = vpack.c.bf16 %v283_v43, %v282_v42 }
  0x5d   : > { %939 = vmatpush.bf16.msra.mxu2 %v929_v18  ;;  %940 = vmatpush.bf16.msra.mxu3 %v929_v18 }
  0x60   : > { %361 = vmatpush.bf16.msra.mxu0 %v928_v19  ;;  %941 = vmatpush.bf16.msra.mxu1 %v928_v19 }
  0x61   : > { %942 = vmatpush.bf16.msra.mxu2 %v928_v19  ;;  %943 = vmatpush.bf16.msra.mxu3 %v928_v19 }
  0x64   : > { %362 = vmatpush.bf16.msra.mxu0 %v927_v20  ;;  %944 = vmatpush.bf16.msra.mxu1 %v927_v20 }
  0x65   : > { %945 = vmatpush.bf16.msra.mxu2 %v927_v20  ;;  %946 = vmatpush.bf16.msra.mxu3 %v927_v20 }
  0x68   : > { %363 = vmatpush.bf16.msra.mxu0 %v926_v21  ;;  %947 = vmatpush.bf16.msra.mxu1 %v926_v21 }
  0x69   : > { %948 = vmatpush.bf16.msra.mxu2 %v926_v21  ;;  %949 = vmatpush.bf16.msra.mxu3 %v926_v21 }
  0x6c   : > { %364 = vmatpush.bf16.msra.mxu0 %v925_v22  ;;  %950 = vmatpush.bf16.msra.mxu1 %v925_v22 }
  0x6d   : > { %951 = vmatpush.bf16.msra.mxu2 %v925_v22  ;;  %952 = vmatpush.bf16.msra.mxu3 %v925_v22 }
  0x70   : > { %365 = vmatpush.bf16.msra.mxu0 %v924_v23  ;;  %953 = vmatpush.bf16.msra.mxu1 %v924_v23 }
  0x71   : > { %954 = vmatpush.bf16.msra.mxu2 %v924_v23  ;;  %955 = vmatpush.bf16.msra.mxu3 %v924_v23 }
  0x73   : > { %366 = vmatmul.bf16.vlgmr.msra.gmra.mxu0 %v284_v32  ;;  %376 = vmatmul.bf16.vlgmr.msra.gmra.mxu1 %v286_v33 }
  0x74   : > { %386 = vmatmul.bf16.vlgmr.msra.gmra.mxu2 %v288_v34  ;;  %396 = vmatmul.bf16.vlgmr.msra.gmra.mxu3 %v290_v35 }
  0x83   : > { %371 = vmatmul.bf16.gmra.mxu0 %v285_v44  ;;  %381 = vmatmul.bf16.gmra.mxu1 %v287_v45 }
  0x84   : > { %391 = vmatmul.bf16.gmra.mxu2 %v289_v46  ;;  %401 = vmatmul.bf16.gmra.mxu3 %v291_v47 }
  0xf0   : > { %v367_v49 = vpop.f32.mrf.mxu0  ;;  %v377_v50 = vpop.f32.mrf.mxu1 }
  0xf1   : > { %v1417_v51 = vadd.f32 %v1024_v48, %v367_v49  ;;  %v1419_v52 = vadd.f32 %v1024_v48, %v377_v50 }
  0xf7   : > { %v387_v53 = vpop.f32.mrf.mxu2  ;;  %v397_v54 = vpop.f32.mrf.mxu3 }
  0xf8   : > { %v1421_v55 = vadd.f32 %v1024_v48, %v387_v53  ;;  %v1423_v56 = vadd.f32 %v1024_v48, %v397_v54  ;;  %v369_v57 = vpop.f32.mrf.mxu0  ;;  %v379_v58 = vpop.f32.mrf.mxu1 }
  0xf9   : > { %v1425_v59 = vadd.f32 %v1024_v48, %v369_v57  ;;  %v1427_v60 = vadd.f32 %v1024_v48, %v379_v58 }
  0xff   : > { %v389_v61 = vpop.f32.mrf.mxu2  ;;  %v399_v62 = vpop.f32.mrf.mxu3 }
 0x100   : > { %v1429_v63 = vadd.f32 %v1024_v48, %v389_v61  ;;  %v1431_v0 = vadd.f32 %v1024_v48, %v399_v62  ;;  %v372_v1 = vpop.f32.mrf.mxu0  ;;  %v382_v2 = vpop.f32.mrf.mxu1 }
 0x101   : > { %v1433_v3 = vadd.f32 %v1024_v48, %v372_v1  ;;  %v1435_v4 = vadd.f32 %v1024_v48, %v382_v2 }
 0x107   : > { %v392_v5 = vpop.f32.mrf.mxu2  ;;  %v402_v6 = vpop.f32.mrf.mxu3 }
 0x108   : > { %v1437_v7 = vadd.f32 %v1024_v48, %v392_v5  ;;  %v1439_v8 = vadd.f32 %v1024_v48, %v402_v6  ;;  %v374_v9 = vpop.f32.mrf.mxu0  ;;  %v384_v10 = vpop.f32.mrf.mxu1 }
 0x109   : > { %v1441_v11 = vadd.f32 %v1024_v48, %v374_v9  ;;  %v1443_v12 = vadd.f32 %v1024_v48, %v384_v10 }
 0x10c   : > { %410 = sbr.rel (%p917_p5) target bundleno = 411 (0x19b), region = 52 }
 0x10f   : > { %v394_v13 = vpop.f32.mrf.mxu2  ;;  %v404_v14 = vpop.f32.mrf.mxu3 }
 0x110   : > { %v1445_v15 = vadd.f32 %v1024_v48, %v394_v13  ;;  %v1447_v16 = vadd.f32 %v1024_v48, %v404_v14 }
 0x111   : > { %v413_v17 = vmul.f32 0.01, %v1417_v51  ;;  %v414_v18 = vmul.f32 0.01, %v1425_v59  ;;  %v415_v19 = vmul.f32 0.01, %v1433_v3 }
 0x112   : > { %v416_v20 = vmul.f32 0.01, %v1441_v11  ;;  %v417_v23 = vmul.f32 0.01, %v1419_v52  ;;  %v418_v25 = vmul.f32 0.01, %v1427_v60 }
 0x113   : > { %v429_v21 = vmax.f32 %v1417_v51, %v413_v17  ;;  %v430_v22 = vmax.f32 %v1425_v59, %v414_v18  ;;  %v431_v24 = vmax.f32 %v1433_v3, %v415_v19  ;;  %v419_v28 = vmul.f32 0.01, %v1435_v4 }
 0x114   : > { %v432_v26 = vmax.f32 %v1441_v11, %v416_v20  ;;  %v433_v29 = vmax.f32 %v1419_v52, %v417_v23  ;;  %v420_v31 = vmul.f32 0.01, %v1443_v12  ;;  %v434_v32 = vmax.f32 %v1427_v60, %v418_v25 }
 0x115   : > { %v445_v27 = vadd.f32 %v430_v22, %v429_v21  ;;  %v421_v34 = vmul.f32 0.01, %v1421_v55  ;;  %v435_v35 = vmax.f32 %v1435_v4, %v419_v28  ;;  %v422_v37 = vmul.f32 0.01, %v1429_v63 }
 0x116   : > { %v436_v38 = vmax.f32 %v1443_v12, %v420_v31  ;;  %v423_v40 = vmul.f32 0.01, %v1437_v7  ;;  %v424_v43 = vmul.f32 0.01, %v1445_v15  ;;  %v425_v46 = vmul.f32 0.01, %v1423_v56 }
 0x117   : > { %v446_v30 = vadd.f32 %v445_v27, %v431_v24  ;;  %v437_v41 = vmax.f32 %v1421_v55, %v421_v34  ;;  %v438_v44 = vmax.f32 %v1429_v63, %v422_v37  ;;  %v426_v49 = vmul.f32 0.01, %v1431_v0 }
 0x118   : > { %v439_v47 = vmax.f32 %v1437_v7, %v423_v40  ;;  %v440_v50 = vmax.f32 %v1445_v15, %v424_v43  ;;  %v427_v54 = vmul.f32 0.01, %v1439_v8  ;;  %v441_v57 = vmax.f32 %v1423_v56, %v425_v46 }
 0x119   : > { %v447_v33 = vadd.f32 %v446_v30, %v432_v26  ;;  %v428_v61 = vmul.f32 0.01, %v1447_v16  ;;  %v442_v62 = vmax.f32 %v1431_v0, %v426_v49 }
 0x11a   : > { %v443_v2 = vmax.f32 %v1439_v8, %v427_v54 }
 0x11b   : > { %v448_v36 = vadd.f32 %v447_v33, %v433_v29  ;;  %v444_v6 = vmax.f32 %v1447_v16, %v428_v61 }
 0x11d   : > { %v449_v39 = vadd.f32 %v448_v36, %v434_v32 }
 0x11f   : > { %v450_v42 = vadd.f32 %v449_v39, %v435_v35 }
 0x121   : > { %v451_v45 = vadd.f32 %v450_v42, %v436_v38 }
 0x123   : > { %v452_v48 = vadd.f32 %v451_v45, %v437_v41 }
 0x125   : > { %v453_v53 = vadd.f32 %v452_v48, %v438_v44 }
 0x127   : > { %v454_v58 = vadd.f32 %v453_v53, %v439_v47 }
 0x129   : > { %v455_v1 = vadd.f32 %v454_v58, %v440_v50 }
 0x12b   : > { %v456_v5 = vadd.f32 %v455_v1, %v441_v57 }
 0x12d   : > { %v457_v9 = vadd.f32 %v456_v5, %v442_v62 }
 0x12f   : > { %v458_v10 = vadd.f32 %v457_v9, %v443_v2 }
 0x131   : > { %v459_v13 = vadd.f32 %v458_v10, %v444_v6 }
 0x133   : > { %v460_v14 = vrot.slane %v459_v13, 4 }
 0x135   : > { %v461_v17 = vadd.f32 %v460_v14, %v459_v13 }
 0x137   : > { %v462_v18 = vrot.slane %v461_v17, 2 }
 0x139   : > { %v463_v19 = vadd.f32 %v462_v18, %v461_v17 }
 0x13b   : > { %v464_v20 = vrot.slane %v463_v19, 1 }
 0x13d   : > { %v465_v23 = vadd.f32 %v464_v20, %v463_v19 }
 0x13f   : > { %v466_v25 = vmul.f32 0.0078125, %v465_v23 }
 0x141   : > { %v1482_v27 = vsub.f32 %v429_v21, %v466_v25  ;;  %v1484_v28 = vsub.f32 %v430_v22, %v466_v25  ;;  %v1486_v30 = vsub.f32 %v431_v24, %v466_v25  ;;  %v1488_v31 = vsub.f32 %v432_v26, %v466_v25 }
 0x142   : > { %v1494_v36 = vsub.f32 %v433_v29, %v466_v25  ;;  %v1498_v39 = vsub.f32 %v434_v32, %v466_v25  ;;  %v1502_v24 = vsub.f32 %v435_v35, %v466_v25  ;;  %v474_v42 = vsub.f32 %v436_v38, %v466_v25 }
 0x143   : > { %v483_v33 = vmul.f32 %v1482_v27, %v1482_v27  ;;  %v484_v34 = vmul.f32 %v1484_v28, %v1484_v28  ;;  %v485_v37 = vmul.f32 %v1486_v30, %v1486_v30  ;;  %v486_v21 = vmul.f32 %v1488_v31, %v1488_v31 }
 0x144   : > { %v487_v26 = vmul.f32 %v1494_v36, %v1494_v36  ;;  %v488_v29 = vmul.f32 %v1498_v39, %v1498_v39  ;;  %v1508_v45 = vsub.f32 %v437_v41, %v466_v25  ;;  %v489_v32 = vmul.f32 %v1502_v24, %v1502_v24 }
 0x145   : > { %v499_v22 = vadd.f32 %v484_v34, %v483_v33  ;;  %v1512_v48 = vsub.f32 %v438_v44, %v466_v25  ;;  %v490_v49 = vmul.f32 %v474_v42, %v474_v42  ;;  %v1514_v53 = vsub.f32 %v439_v47, %v466_v25 }
 0x146   : > { %v491_v54 = vmul.f32 %v1508_v45, %v1508_v45  ;;  %v1518_v58 = vsub.f32 %v440_v50, %v466_v25  ;;  %v1522_v1 = vsub.f32 %v441_v57, %v466_v25  ;;  %v1526_v9 = vsub.f32 %v442_v62, %v466_v25 }
 0x147   : > { %v500_v40 = vadd.f32 %v499_v22, %v485_v37  ;;  %v492_v41 = vmul.f32 %v1512_v48, %v1512_v48  ;;  %v493_v44 = vmul.f32 %v1514_v53, %v1514_v53  ;;  %v1530_v13 = vsub.f32 %v443_v2, %v466_v25 }
 0x148   : > { %v494_v47 = vmul.f32 %v1518_v58, %v1518_v58  ;;  %v495_v50 = vmul.f32 %v1522_v1, %v1522_v1  ;;  %v1534_v17 = vsub.f32 %v444_v6, %v466_v25  ;;  %v496_v57 = vmul.f32 %v1526_v9, %v1526_v9 }
 0x149   : > { %v501_v43 = vadd.f32 %v500_v40, %v486_v21  ;;  %v497_v62 = vmul.f32 %v1530_v13, %v1530_v13 }
 0x14a   : > { %v498_v20 = vmul.f32 %v1534_v17, %v1534_v17 }
 0x14b   : > { %v502_v46 = vadd.f32 %v501_v43, %v487_v26 }
 0x14d   : > { %v503_v35 = vadd.f32 %v502_v46, %v488_v29 }
 0x14f   : > { %v504_v38 = vadd.f32 %v503_v35, %v489_v32 }
 0x151   : > { %v505_v61 = vadd.f32 %v504_v38, %v490_v49 }
 0x153   : > { %v506_v5 = vadd.f32 %v505_v61, %v491_v54  ;;  %v1025_v54 = vld [vmem:[%s1404_s4 + $0x1] ss:$0 sm:$0xff]  ;;  %v1026_v61 = vld [vmem:[%s1404_s4 + $0x2] ss:$0 sm:$0xff] }
 0x155   : > { %v507_v10 = vadd.f32 %v506_v5, %v492_v41 }
 0x157   : > { %v508_v14 = vadd.f32 %v507_v10, %v493_v44 }
 0x159   : > { %v509_v18 = vadd.f32 %v508_v14, %v494_v47 }
 0x15b   : > { %v510_v19 = vadd.f32 %v509_v18, %v495_v50 }
 0x15d   : > { %v511_v23 = vadd.f32 %v510_v19, %v496_v57 }
 0x15f   : > { %v512_v2 = vadd.f32 %v511_v23, %v497_v62 }
 0x161   : > { %v513_v33 = vadd.f32 %v512_v2, %v498_v20 }
 0x163   : > { %v514_v34 = vrot.slane %v513_v33, 4 }
 0x165   : > { %v515_v37 = vadd.f32 %v514_v34, %v513_v33 }
 0x167   : > { %v516_v21 = vrot.slane %v515_v37, 2 }
 0x169   : > { %v517_v6 = vadd.f32 %v516_v21, %v515_v37 }
 0x16b   : > { %v518_v25 = vrot.slane %v517_v6, 1 }
 0x16d   : > { %v519_v22 = vadd.f32 %v518_v25, %v517_v6 }
 0x16f   : > { %v520_v26 = vmul.f32 0.0078125, %v519_v22 }
 0x171   : > { %v521_v40 = vadd.f32 1e-05, %v520_v26 }
 0x173   : > { %1027 = vrsqrt.f32 %v521_v40  ;;  %vm528_vm0 = vweird.f32 %v521_v40 }
 0x179   : > { %v1028_v29 = vpop.eup %1027 }
 0x17a   : > { %v523_v43 = vmul.f32 %v1028_v29, %v521_v40  ;;  %vm529_vm1 = vweird.f32 %v1028_v29 }
 0x17b   : > { %vm530_vm2 = vmor %vm528_vm0, %vm529_vm1 }
 0x17c   : > { %v524_v32 = vmul.f32 %v1028_v29, %v523_v43 }
 0x17e   : > { %v525_v46 = vmul.f32 0.5, %v524_v32 }
 0x180   : > { %v526_v49 = vsub.f32 1.5, %v525_v46 }
 0x182   : > { %v527_v35 = vmul.f32 %v1028_v29, %v526_v49 }
 0x184   : > { %v531_v38 = vsel %vm530_vm2, %v1028_v29, %v527_v35 }
 0x185   : > { %v532_v41 = vmul.f32 %v531_v38, %v1482_v27  ;;  %v533_v44 = vmul.f32 %v531_v38, %v1484_v28  ;;  %v534_v5 = vmul.f32 %v531_v38, %v1486_v30  ;;  %v535_v47 = vmul.f32 %v531_v38, %v1488_v31 }
 0x186   : > { %v536_v10 = vmul.f32 %v531_v38, %v1494_v36  ;;  %v537_v50 = vmul.f32 %v531_v38, %v1498_v39  ;;  %v538_v14 = vmul.f32 %v531_v38, %v1502_v24  ;;  %v539_v57 = vmul.f32 %v531_v38, %v474_v42 }
 0x187   : > { %v549_v18 = vmul.f32 %v1025_v54, %v532_v41  ;;  %v550_v62 = vmul.f32 %v1025_v54, %v533_v44  ;;  %v551_v19 = vmul.f32 %v1025_v54, %v534_v5  ;;  %v552_v20 = vmul.f32 %v1025_v54, %v535_v47 }
 0x188   : > { %v553_v23 = vmul.f32 %v1025_v54, %v536_v10  ;;  %v554_v27 = vmul.f32 %v1025_v54, %v537_v50  ;;  %v555_v2 = vmul.f32 %v1025_v54, %v538_v14  ;;  %v556_v31 = vmul.f32 %v1025_v54, %v539_v57 }
 0x189   : > { %v566_v33 = vadd.f32 %v1026_v61, %v549_v18  ;;  %v567_v28 = vadd.f32 %v1026_v61, %v550_v62  ;;  %v568_v34 = vadd.f32 %v1026_v61, %v551_v19  ;;  %v569_v30 = vadd.f32 %v1026_v61, %v552_v20 }
 0x18a   : > { %v570_v37 = vadd.f32 %v1026_v61, %v553_v23  ;;  %v540_v36 = vmul.f32 %v531_v38, %v1508_v45  ;;  %v541_v39 = vmul.f32 %v531_v38, %v1512_v48  ;;  %v542_v24 = vmul.f32 %v531_v38, %v1514_v53 }
 0x18b   : > { %582 = vst [vmem:[#allocation2 + $0x30] sm:$0xff] %v566_v33  ;;  %v543_v42 = vmul.f32 %v531_v38, %v1518_v58  ;;  %v571_v21 = vadd.f32 %v1026_v61, %v554_v27  ;;  %v572_v6 = vadd.f32 %v1026_v61, %v555_v2  ;;  %v544_v25 = vmul.f32 %v531_v38, %v1522_v1 }
 0x18c   : > { %583 = vst [vmem:[#allocation2] sm:$0xff] %v567_v28  ;;  %v545_v22 = vmul.f32 %v531_v38, %v1526_v9  ;;  %v557_v26 = vmul.f32 %v1025_v54, %v540_v36  ;;  %v558_v40 = vmul.f32 %v1025_v54, %v541_v39  ;;  %v559_v29 = vmul.f32 %v1025_v54, %v542_v24 }
 0x18d   : > { %584 = vst [vmem:[#allocation2 + $0x58] sm:$0xff] %v568_v34  ;;  %v546_v43 = vmul.f32 %v531_v38, %v1530_v13  ;;  %v573_v45 = vadd.f32 %v1026_v61, %v556_v31  ;;  %v560_v48 = vmul.f32 %v1025_v54, %v543_v42  ;;  %v547_v53 = vmul.f32 %v531_v38, %v1534_v17 }
 0x18e   : > { %585 = vst [vmem:[#allocation2 + $0x18] sm:$0xff] %v569_v30  ;;  %v574_v58 = vadd.f32 %v1026_v61, %v557_v26  ;;  %v561_v32 = vmul.f32 %v1025_v54, %v544_v25  ;;  %v575_v46 = vadd.f32 %v1026_v61, %v558_v40  ;;  %v562_v49 = vmul.f32 %v1025_v54, %v545_v22 }
 0x18f   : > { %586 = vst [vmem:[#allocation2 + $0x50] sm:$0xff] %v570_v37  ;;  %v576_v1 = vadd.f32 %v1026_v61, %v559_v29  ;;  %v563_v9 = vmul.f32 %v1025_v54, %v546_v43  ;;  %v577_v35 = vadd.f32 %v1026_v61, %v560_v48  ;;  %v564_v41 = vmul.f32 %v1025_v54, %v547_v53 }
 0x190   : > { %587 = vst [vmem:[#allocation2 + $0x68] sm:$0xff] %v571_v21  ;;  %v578_v44 = vadd.f32 %v1026_v61, %v561_v32  ;;  %v579_v13 = vadd.f32 %v1026_v61, %v562_v49 }
 0x191   : > { %588 = vst [vmem:[#allocation2 + $0x8] sm:$0xff] %v572_v6  ;;  %v580_v5 = vadd.f32 %v1026_v61, %v563_v9  ;;  %v581_v17 = vadd.f32 %v1026_v61, %v564_v41 }
 0x192   : > { %589 = vst [vmem:[#allocation2 + $0x48] sm:$0xff] %v573_v45 }
 0x193   : > { %590 = vst [vmem:[#allocation2 + $0x40] sm:$0xff] %v574_v58 }
 0x194   : > { %591 = vst [vmem:[#allocation2 + $0x20] sm:$0xff] %v575_v46 }
 0x195   : > { %592 = vst [vmem:[#allocation2 + $0x10] sm:$0xff] %v576_v1 }
 0x196   : > { %593 = vst [vmem:[#allocation2 + $0x38] sm:$0xff] %v577_v35 }
 0x197   : > { %594 = vst [vmem:[#allocation2 + $0x60] sm:$0xff] %v578_v44 }
 0x198   : > { %595 = vst [vmem:[#allocation2 + $0x70] sm:$0xff] %v579_v13 }
 0x199   : > { %596 = vst [vmem:[#allocation2 + $0x78] sm:$0xff] %v580_v5 }
 0x19a   : > { %597 = vst [vmem:[#allocation2 + $0x28] sm:$0xff] %v581_v17 }
 0x19b PF: > { %p918_p7 = scmp.ne.s32.totalorder %s1347_s20, 3 }
 0x19d   : > { %601 = sbr.rel (%p918_p7) target bundleno = 716 (0x2cc), region = 56 }
 0x1a2   : > { %610 = vmax.xlane.f32.xlu2 %v1419_v52  ;;  %606 = vmax.xlane.f32.xlu1 %v1433_v3 }
 0x1a3   : > { %602 = vmax.xlane.f32.xlu0 %v1417_v51 }
 0x1aa   : > { %612 = vmax.xlane.f32.xlu2 %v1427_v60  ;;  %608 = vmax.xlane.f32.xlu1 %v1441_v11 }
 0x1ab   : > { %604 = vmax.xlane.f32.xlu0 %v1425_v59 }
 0x1b2   : > { %618 = vmax.xlane.f32.xlu2 %v1421_v55  ;;  %616 = vmax.xlane.f32.xlu1 %v1443_v12 }
 0x1b3   : > { %614 = vmax.xlane.f32.xlu0 %v1435_v4 }
 0x1ba   : > { %624 = vmax.xlane.f32.xlu2 %v1445_v15  ;;  %622 = vmax.xlane.f32.xlu1 %v1437_v7 }
 0x1bb   : > { %620 = vmax.xlane.f32.xlu0 %v1429_v63 }
 0x1c2   : > { %630 = vmax.xlane.f32.xlu2 %v1439_v8  ;;  %628 = vmax.xlane.f32.xlu1 %v1431_v0 }
 0x1c3   : > { %626 = vmax.xlane.f32.xlu0 %v1423_v56 }
 0x1cb   : > { %632 = vmax.xlane.f32.xlu0 %v1447_v16 }
 0x215   : > { %v611_v54 = vpop.xlane.xlu2 %610  ;;  %v607_v38 = vpop.xlane.xlu1 %606 }
 0x216   : > { %v1577_v61 = vsub.f32 %v1433_v3, %v607_v38  ;;  %v603_v47 = vpop.xlane.xlu0 %602 }
 0x217   : > { %v1580_v10 = vsub.f32 %v1417_v51, %v603_v47 }
 0x218   : > { %v654_v50 = vmul.f32 1.442695, %v1577_v61 }
 0x219   : > { %v650_v14 = vmul.f32 1.442695, %v1580_v10 }
 0x21a   : > { %1029 = vpow2.f32 %v654_v50 }
 0x21b   : > { %1031 = vpow2.f32 %v650_v14 }
 0x21d   : > { %v613_v57 = vpop.xlane.xlu2 %612  ;;  %v609_v18 = vpop.xlane.xlu1 %608 }
 0x21e   : > { %v1585_v62 = vsub.f32 %v1427_v60, %v613_v57  ;;  %v1588_v19 = vsub.f32 %v1441_v11, %v609_v18  ;;  %v605_v3 = vpop.xlane.xlu0 %604  ;;  %v1597_v60 = vsub.f32 %v1419_v52, %v611_v54 }
 0x21f   : > { %v1591_v20 = vsub.f32 %v1425_v59, %v605_v3 }
 0x220   : > { %v660_v51 = vmul.f32 1.442695, %v1585_v62  ;;  %v656_v23 = vmul.f32 1.442695, %v1588_v19  ;;  %v1030_v27 = vpop.eup %1029  ;;  %v658_v31 = vmul.f32 1.442695, %v1597_v60 }
 0x221   : > { %v652_v2 = vmul.f32 1.442695, %v1591_v20  ;;  %v1032_v33 = vpop.eup %1031  ;;  %686 = vadd.xlane.f32.xlu0 %v1030_v27 }
 0x222   : > { %1033 = vpow2.f32 %v660_v51  ;;  %682 = vadd.xlane.f32.xlu1 %v1032_v33 }
 0x223   : > { %1035 = vpow2.f32 %v656_v23 }
 0x224   : > { %1037 = vpow2.f32 %v652_v2 }
 0x225   : > { %v619_v11 = vpop.xlane.xlu2 %618  ;;  %v617_v28 = vpop.xlane.xlu1 %616 }
 0x226   : > { %v1600_v59 = vsub.f32 %v1421_v55, %v619_v11  ;;  %v615_v34 = vpop.xlane.xlu0 %614  ;;  %v1609_v52 = vsub.f32 %v1443_v12, %v617_v28 }
 0x227   : > { %v1603_v30 = vsub.f32 %v1435_v4, %v615_v34 }
 0x228   : > { %v1034_v37 = vpop.eup %1033  ;;  %v666_v36 = vmul.f32 1.442695, %v1600_v59  ;;  %v664_v4 = vmul.f32 1.442695, %v1609_v52 }
 0x229   : > { %v1036_v39 = vpop.eup %1035  ;;  %v662_v24 = vmul.f32 1.442695, %v1603_v30  ;;  %692 = vadd.xlane.f32.xlu0 %v1034_v37 }
 0x22a   : > { %v1038_v42 = vpop.eup %1037  ;;  %1039 = vpow2.f32 %v666_v36  ;;  %688 = vadd.xlane.f32.xlu1 %v1036_v39 }
 0x22b   : > { %1041 = vpow2.f32 %v662_v24  ;;  %684 = vadd.xlane.f32.xlu2 %v1038_v42 }
 0x22c   : > { %1043 = vpow2.f32 %v658_v31 }
 0x22d   : > { %v625_v55 = vpop.xlane.xlu2 %624  ;;  %v623_v21 = vpop.xlane.xlu1 %622  ;;  %1045 = vpow2.f32 %v664_v4 }
 0x22e   : > { %v1613_v6 = vsub.f32 %v1445_v15, %v625_v55  ;;  %v621_v25 = vpop.xlane.xlu0 %620  ;;  %v1621_v43 = vsub.f32 %v1437_v7, %v623_v21 }
 0x22f   : > { %v1616_v22 = vsub.f32 %v1429_v63, %v621_v25 }
 0x230   : > { %v1040_v12 = vpop.eup %1039  ;;  %v672_v26 = vmul.f32 1.442695, %v1613_v6  ;;  %v670_v63 = vmul.f32 1.442695, %v1621_v43 }
 0x231   : > { %v1042_v40 = vpop.eup %1041  ;;  %v668_v29 = vmul.f32 1.442695, %v1616_v22  ;;  %698 = vadd.xlane.f32.xlu0 %v1040_v12 }
 0x232   : > { %v1044_v45 = vpop.eup %1043  ;;  %1047 = vpow2.f32 %v672_v26  ;;  %694 = vadd.xlane.f32.xlu1 %v1042_v40 }
 0x233   : > { %1049 = vpow2.f32 %v668_v29  ;;  %690 = vadd.xlane.f32.xlu2 %v1044_v45  ;;  %v1046_v58 = vpop.eup %1045 }
 0x234   : > { %1051 = vpow2.f32 %v670_v63 }
 0x235   : > { %v631_v15 = vpop.xlane.xlu2 %630  ;;  %v629_v46 = vpop.xlane.xlu1 %628 }
 0x236   : > { %v1625_v48 = vsub.f32 %v1439_v8, %v631_v15  ;;  %v627_v53 = vpop.xlane.xlu0 %626  ;;  %v1633_v35 = vsub.f32 %v1431_v0, %v629_v46 }
 0x237   : > { %v1628_v32 = vsub.f32 %v1423_v56, %v627_v53 }
 0x238   : > { %v1048_v7 = vpop.eup %1047  ;;  %v678_v49 = vmul.f32 1.442695, %v1625_v48  ;;  %v676_v8 = vmul.f32 1.442695, %v1633_v35 }
 0x239   : > { %v1050_v1 = vpop.eup %1049  ;;  %v674_v9 = vmul.f32 1.442695, %v1628_v32  ;;  %704 = vadd.xlane.f32.xlu0 %v1048_v7 }
 0x23a   : > { %1053 = vpow2.f32 %v678_v49  ;;  %700 = vadd.xlane.f32.xlu1 %v1050_v1  ;;  %v1052_v41 = vpop.eup %1051 }
 0x23b   : > { %1055 = vpow2.f32 %v674_v9  ;;  %696 = vadd.xlane.f32.xlu2 %v1046_v58 }
 0x23c   : > { %1057 = vpow2.f32 %v676_v8 }
 0x23e   : > { %v633_v56 = vpop.xlane.xlu0 %632 }
 0x23f   : > { %v1637_v44 = vsub.f32 %v1447_v16, %v633_v56 }
 0x240   : > { %v1054_v13 = vpop.eup %1053 }
 0x241   : > { %v1056_v5 = vpop.eup %1055  ;;  %v680_v17 = vmul.f32 1.442695, %v1637_v44  ;;  %710 = vadd.xlane.f32.xlu0 %v1054_v13 }
 0x242   : > { %706 = vadd.xlane.f32.xlu1 %v1056_v5  ;;  %v1058_v0 = vpop.eup %1057 }
 0x243   : > { %1059 = vpow2.f32 %v680_v17  ;;  %702 = vadd.xlane.f32.xlu2 %v1052_v41 }
 0x249   : > { %v1060_v54 = vpop.eup %1059 }
 0x24a   : > { %712 = vadd.xlane.f32.xlu1 %v1060_v54 }
 0x24b   : > { %708 = vadd.xlane.f32.xlu2 %v1058_v0 }
 0x294   : > { %v687_v38 = vpop.xlane.xlu0 %686 }
 0x295   : > { %v683_v47 = vpop.xlane.xlu1 %682  ;;  %1061 = vlog2.f32 %v687_v38 }
 0x296   : > { %1063 = vlog2.f32 %v683_v47 }
 0x29b   : > { %v1062_v50 = vpop.eup %1061 }
 0x29c   : > { %v1064_v16 = vpop.eup %1063  ;;  %v719_v14 = vmul.f32 0.6931472, %v1062_v50  ;;  %v693_v57 = vpop.xlane.xlu0 %692 }
 0x29d   : > { %v715_v18 = vmul.f32 0.6931472, %v1064_v16  ;;  %v689_v3 = vpop.xlane.xlu1 %688  ;;  %1065 = vlog2.f32 %v693_v57 }
 0x29e   : > { %v685_v51 = vpop.xlane.xlu2 %684  ;;  %v748_v23 = vsub.f32 %v1577_v61, %v719_v14  ;;  %1067 = vlog2.f32 %v689_v3 }
 0x29f   : > { %v746_v27 = vsub.f32 %v1580_v10, %v715_v18  ;;  %1069 = vlog2.f32 %v685_v51 }
 0x2a0   : > { %764 = vst [vmem:[#allocation9 + $0x10] sm:$0xff] %v748_v23 }
 0x2a1   : > { %762 = vst [vmem:[#allocation9] sm:$0xff] %v746_v27 }
 0x2a3   : > { %v1066_v2 = vpop.eup %1065 }
 0x2a4   : > { %v1068_v33 = vpop.eup %1067  ;;  %v725_v11 = vmul.f32 0.6931472, %v1066_v2  ;;  %v699_v28 = vpop.xlane.xlu0 %698 }
 0x2a5   : > { %v1070_v34 = vpop.eup %1069  ;;  %v721_v37 = vmul.f32 0.6931472, %v1068_v33  ;;  %v695_v36 = vpop.xlane.xlu1 %694  ;;  %1071 = vlog2.f32 %v699_v28 }
 0x2a6   : > { %v691_v31 = vpop.xlane.xlu2 %690  ;;  %v717_v39 = vmul.f32 0.6931472, %v1070_v34  ;;  %v751_v24 = vsub.f32 %v1585_v62, %v725_v11 }
 0x2a7   : > { %1073 = vlog2.f32 %v691_v31  ;;  %v749_v61 = vsub.f32 %v1588_v19, %v721_v37 }
 0x2a8   : > { %1075 = vlog2.f32 %v695_v36  ;;  %v747_v10 = vsub.f32 %v1591_v20, %v717_v39  ;;  %767 = vst [vmem:[#allocation9 + $0x28] sm:$0xff] %v751_v24 }
 0x2a9   : > { %765 = vst [vmem:[#allocation9 + $0x18] sm:$0xff] %v749_v61 }
 0x2aa   : > { %763 = vst [vmem:[#allocation9 + $0x8] sm:$0xff] %v747_v10 }
 0x2ab   : > { %v1072_v42 = vpop.eup %1071 }
 0x2ac   : > { %v731_v4 = vmul.f32 0.6931472, %v1072_v42  ;;  %v705_v21 = vpop.xlane.xlu0 %704 }
 0x2ad   : > { %v1074_v55 = vpop.eup %1073  ;;  %v701_v40 = vpop.xlane.xlu1 %700  ;;  %1077 = vlog2.f32 %v705_v21 }
 0x2ae   : > { %v1076_v25 = vpop.eup %1075  ;;  %v723_v12 = vmul.f32 0.6931472, %v1074_v55  ;;  %v697_v26 = vpop.xlane.xlu2 %696  ;;  %v754_v62 = vsub.f32 %v1600_v59, %v731_v4 }
 0x2af   : > { %v727_v29 = vmul.f32 0.6931472, %v1076_v25  ;;  %1079 = vlog2.f32 %v697_v26 }
 0x2b0   : > { %v750_v19 = vsub.f32 %v1597_v60, %v723_v12  ;;  %1081 = vlog2.f32 %v701_v40  ;;  %770 = vst [vmem:[#allocation9 + $0x40] sm:$0xff] %v754_v62 }
 0x2b1   : > { %v752_v20 = vsub.f32 %v1603_v30, %v727_v29 }
 0x2b2   : > { %766 = vst [vmem:[#allocation9 + $0x20] sm:$0xff] %v750_v19 }
 0x2b3   : > { %768 = vst [vmem:[#allocation9 + $0x30] sm:$0xff] %v752_v20  ;;  %v1078_v45 = vpop.eup %1077 }
 0x2b4   : > { %v737_v63 = vmul.f32 0.6931472, %v1078_v45  ;;  %v711_v53 = vpop.xlane.xlu0 %710 }
 0x2b5   : > { %v1080_v15 = vpop.eup %1079  ;;  %v707_v49 = vpop.xlane.xlu1 %706  ;;  %1083 = vlog2.f32 %v711_v53 }
 0x2b6   : > { %v1082_v58 = vpop.eup %1081  ;;  %v729_v46 = vmul.f32 0.6931472, %v1080_v15  ;;  %v703_v7 = vpop.xlane.xlu2 %702  ;;  %v757_v59 = vsub.f32 %v1613_v6, %v737_v63 }
 0x2b7   : > { %v733_v1 = vmul.f32 0.6931472, %v1082_v58  ;;  %1085 = vlog2.f32 %v703_v7 }
 0x2b8   : > { %v753_v60 = vsub.f32 %v1609_v52, %v729_v46  ;;  %1087 = vlog2.f32 %v707_v49  ;;  %773 = vst [vmem:[#allocation9 + $0x58] sm:$0xff] %v757_v59 }
 0x2b9   : > { %v755_v30 = vsub.f32 %v1616_v22, %v733_v1 }
 0x2ba   : > { %769 = vst [vmem:[#allocation9 + $0x38] sm:$0xff] %v753_v60 }
 0x2bb   : > { %771 = vst [vmem:[#allocation9 + $0x48] sm:$0xff] %v755_v30  ;;  %v1084_v9 = vpop.eup %1083 }
 0x2bc   : > { %v743_v56 = vmul.f32 0.6931472, %v1084_v9 }
 0x2bd   : > { %v1086_v8 = vpop.eup %1085  ;;  %v713_v17 = vpop.xlane.xlu1 %712 }
 0x2be   : > { %v1088_v41 = vpop.eup %1087  ;;  %v735_v13 = vmul.f32 0.6931472, %v1086_v8  ;;  %v709_v5 = vpop.xlane.xlu2 %708  ;;  %v760_v54 = vsub.f32 %v1625_v48, %v743_v56 }
 0x2bf   : > { %v739_v0 = vmul.f32 0.6931472, %v1088_v41  ;;  %1089 = vlog2.f32 %v709_v5 }
 0x2c0   : > { %v756_v6 = vsub.f32 %v1621_v43, %v735_v13  ;;  %1091 = vlog2.f32 %v713_v17  ;;  %776 = vst [vmem:[#allocation9 + $0x70] sm:$0xff] %v760_v54 }
 0x2c1   : > { %v758_v52 = vsub.f32 %v1628_v32, %v739_v0 }
 0x2c2   : > { %772 = vst [vmem:[#allocation9 + $0x50] sm:$0xff] %v756_v6 }
 0x2c3   : > { %774 = vst [vmem:[#allocation9 + $0x60] sm:$0xff] %v758_v52 }
 0x2c5   : > { %v1090_v22 = vpop.eup %1089 }
 0x2c6   : > { %v1092_v38 = vpop.eup %1091  ;;  %v741_v47 = vmul.f32 0.6931472, %v1090_v22 }
 0x2c7   : > { %v745_v50 = vmul.f32 0.6931472, %v1092_v38 }
 0x2c8   : > { %v759_v16 = vsub.f32 %v1633_v35, %v741_v47 }
 0x2c9   : > { %v761_v14 = vsub.f32 %v1637_v44, %v745_v50 }
 0x2ca   : > { %775 = vst [vmem:[#allocation9 + $0x68] sm:$0xff] %v759_v16 }
 0x2cb   : > { %777 = vst [vmem:[#allocation9 + $0x78] sm:$0xff] %v761_v14 }
 0x2cc PF: > { %p982_p1 = scmp.eq.s32.totalorder %s1347_s20, 3  ;;  %s1260_s22 = smov [#allocation9]  }
 0x2cd   : > { %s783_s26 = sshll.u32 %s1260_s22, 4  ;;  %s785_s9 = sshll.u32 %s1676_s3, 4  ;;  %s784_s26 = int_to_ptr.vmem [resolvable:$true] %s783_s26  ;;  %s786_s9 = int_to_ptr.hbm [resolvable:$true] %s785_s9 }
 0x2ce   : > { %s1261_s10 = smov 128   ;;  %s1262_s11 = smov 8  }
 0x2cf   : > { %965 = dma.vmem_to_hbm [thread:$0]  (%p982_p1), %s784_s26, 2048, %s786_s9, [#allocation5], %s1261_s10, %s1261_s10, %s1262_s11  }
 0x2d0   : > { %1236 = dma.done.wait (%p982_p1), [#allocation5], 2048  }
 0x2d1   : > { %1238 = vsyncadd (%p982_p1), [#allocation5], 4294965248 }
 0x2d2 PF: > { %p15_p4 = scmp.ge.s32.totalorder %s1304_s16, 6   ;;  %s1680_s12 = smov %s1245_s13 }
 0x2d3   : > { %s1681_s13 = smov %s1249_s14  ;;  %s1682_s14 = smov %s1314_s19 }
 0x2d4   : > { %s1683_s15 = smov %s1304_s16  ;;  %17 = sbr.rel (!%p15_p4) target bundleno = 5 (0x5), region = 97 }
 0x2d9   :  { %802 = vsyncpa [#allocation4], 1 }
 0x2da   :  { %804 = vsyncpa [#allocation4 + $0x1], 1 }
 0x2db   :  { %805 = vsyncpa [#allocation7], 1 }
 0x2dc   :  { %807 = vsyncpa [#allocation7 + $0x1], 1 }
 0x2dd   :  { %808 = vsyncpa [#allocation5], 1 }
 0x2de   :  { %810 = vsyncpa [#allocation5 + $0x1], 1 }

</bundles_post_ra>
